<compile_context>
chip_gen: v6e
topology: v6e:2x2x1
jax: 0.10.0
libtpu: 0.0.40
codegen_flags: <defaults>
</compile_context>

<pallas_src>
import math

import jax
import jax.numpy as jnp
from jax.experimental import pallas as pl
from jax.experimental.pallas import tpu as pltpu


def _cdiv(a, b):
    return (a + b - 1) // b


def _round_up(x, m):
    return ((x + m - 1) // m) * m


def _num_tensorcores():
    """Best-effort TensorCore-per-device count (v7x megacore); defaults to 1."""
    try:
        d = jax.devices()[0]
        return max(1, int(getattr(d, "num_cores", 1) or 1))
    except Exception:
        return 1


# ----------------------------------------------------------------------------
# Kernel
# ----------------------------------------------------------------------------
def critic_kernel(s_ref, a_ref, w1s_ref, w1a_ref, b1_ref,
                  w2_ref, b2_ref, w3_ref, b3_ref, o_ref):
    cdt = w1s_ref.dtype                      # MXU operand dtype (bf16 or f32)
    s = s_ref[...].astype(cdt)               # cast in-kernel, not in wrapper
    a = a_ref[...].astype(cdt)

    # fc1 over the (virtually concatenated) [state, action] input + ReLU.
    # w1 is pre-split at prepare time, so the concat never materializes.
    h1 = (jnp.dot(s, w1s_ref[...], preferred_element_type=jnp.float32)
          + jnp.dot(a, w1a_ref[...], preferred_element_type=jnp.float32)
          + b1_ref[...])
    h1 = jnp.maximum(h1, 0.0)

    # fc2 + ReLU (f32 accumulation, f32 bias).
    h2 = (jnp.dot(h1.astype(cdt), w2_ref[...],
                  preferred_element_type=jnp.float32)
          + b2_ref[...])
    h2 = jnp.maximum(h2, 0.0)

    # q1 head (fc2 -> 1): N=1 matmul replaced by VPU multiply + lane reduce.
    q = jnp.sum(h2 * w3_ref[...].astype(jnp.float32), axis=-1, keepdims=True)
    o_ref[...] = (q + b3_ref[...]).astype(o_ref.dtype)


# ----------------------------------------------------------------------------
# Parameter preparation (run ONCE per parameter update, not per forward)
# ----------------------------------------------------------------------------
def prepare_params(params, state_dim, *, compute_dtype=jnp.bfloat16):
    """Split/cast/reshape the weights once so the per-call wrapper does no
    HBM-pass preprocessing."""
    w1, b1, w2, b2, w3, b3 = params          # w1: (state+act, fc1), w3: (fc2, 1)
    cdt = jnp.dtype(compute_dtype)
    fc2 = w2.shape[1]
    return (
        w1[:state_dim].astype(cdt),          # (state_dim, fc1)
        w1[state_dim:].astype(cdt),          # (action_dim, fc1)
        b1.astype(jnp.float32).reshape(1, -1),
        w2.astype(cdt),                      # (fc1, fc2)
        b2.astype(jnp.float32).reshape(1, -1),
        w3.reshape(1, fc2).astype(cdt),      # row layout for the VPU head
        b3.astype(jnp.float32).reshape(1, 1),
    )


# ----------------------------------------------------------------------------
# Forward wrapper
# ----------------------------------------------------------------------------
def critic_forward(state, action, prepared, *, tile_b=4096):
    """Pallas-backed CriticNetwork.forward(state, action) -> (B, 1) f32.

    `prepared` must come from prepare_params()."""
    w1s, w1a, b1, w2, b2, w3row, b3 = prepared
    B, state_dim = state.shape
    action_dim = action.shape[1]
    fc1 = w1s.shape[1]
    fc2 = w2.shape[1]

    # Sublane packing of the *input* dtype (8 rows for f32, 16 for bf16).
    sub = max(8, 32 // jnp.dtype(state.dtype).itemsize)

    # ---- batch tiling ------------------------------------------------------
    # Few, large grid steps (per-step overhead dominates this tiny net).
    # If the device has >1 TensorCore and the batch is big, use a multiple of
    # the core count so the "parallel" batch axis can be sharded (megacore).
    ncores = _num_tensorcores()
    n_steps = _cdiv(B, max(int(tile_b), sub))
    if ncores > 1 and B >= ncores * 512:
        n_steps = _round_up(max(n_steps, ncores), ncores)

    if n_steps <= 1:
        tile = B                              # block == full array dims: always legal
    else:
        tile = _round_up(_cdiv(B, n_steps), sub)   # multiple of sublane packing
    grid = (_cdiv(B, tile),)                  # tail block may be partial (masked)

    def batch_spec(feat):
        return pl.BlockSpec((tile, feat), lambda i: (i, 0))

    def resident_spec(x):
        # Weights / biases: same block every grid step -> stay VMEM-resident.
        return pl.BlockSpec(x.shape, lambda i: (0, 0))

    in_specs = [
        batch_spec(state_dim),                # state tile
        batch_spec(action_dim),               # action tile
        resident_spec(w1s),
        resident_spec(w1a),
        resident_spec(b1),
        resident_spec(w2),
        resident_spec(b2),
        resident_spec(w3row),
        resident_spec(b3),
    ]
    out_spec = batch_spec(1)

    operands = (state, action, w1s, w1a, b1, w2, b2, w3row, b3)
    flops = 2 * B * (state_dim * fc1 + action_dim * fc1 + fc1 * fc2 + fc2)
    bytes_accessed = sum(int(x.size) * x.dtype.itemsize for x in operands)
    bytes_accessed += B * 4                   # f32 output

    return pl.pallas_call(
        critic_kernel,
        out_shape=jax.ShapeDtypeStruct((B, 1), jnp.float32),
        grid=grid,
        in_specs=in_specs,
        out_specs=out_spec,
        compiler_params=pltpu.CompilerParams(
            dimension_semantics=("parallel",)),
        cost_estimate=pl.CostEstimate(
            flops=flops, transcendentals=0, bytes_accessed=bytes_accessed),
    )(*operands)


# ----------------------------------------------------------------------------
# Init / reference
# ----------------------------------------------------------------------------
def init_params(key, input_dim, no_actions, fc1_dims, fc2_dims):
    """Deterministic init mimicking PyTorch nn.Linear default
    (uniform(-1/sqrt(fan_in), 1/sqrt(fan_in)))."""
    def linear(k, fan_in, fan_out):
        kw, kb = jax.random.split(k)
        bound = 1.0 / math.sqrt(fan_in)
        w = jax.random.uniform(kw, (fan_in, fan_out), jnp.float32, -bound, bound)
        b = jax.random.uniform(kb, (1, fan_out), jnp.float32, -bound, bound)
        return w, b

    k1, k2, k3 = jax.random.split(key, 3)
    w1, b1 = linear(k1, input_dim + no_actions, fc1_dims)
    w2, b2 = linear(k2, fc1_dims, fc2_dims)
    w3, b3 = linear(k3, fc2_dims, 1)
    return (w1, b1, w2, b2, w3, b3)


def _reference(state, action, params):
    w1, b1, w2, b2, w3, b3 = params
    x = jnp.concatenate([state, action], axis=1)
    h = jnp.maximum(x @ w1 + b1, 0.0)
    h = jnp.maximum(h @ w2 + b2, 0.0)
    return h @ w3 + b3


if __name__ == "__main__":
    # Shapes consistent with the module: state_dim=16, no_actions=4,
    # fc1_dims=32, fc2_dims=32.
    input_dims = (16,)
    no_actions = 4
    fc1_dims = 32
    fc2_dims = 32

    key = jax.random.PRNGKey(0)
    k_state, k_action, k_params, k_big = jax.random.split(key, 4)
    params = init_params(k_params, input_dims[0], no_actions, fc1_dims, fc2_dims)

    # Weight preprocessing hoisted out of the hot path (done once).
    prep_f32 = prepare_params(params, input_dims[0], compute_dtype=jnp.float32)
    prep_bf16 = prepare_params(params, input_dims[0], compute_dtype=jnp.bfloat16)

    # --- check 1: tiny batch (B=2), f32 path, tight tolerance ------------------
    batch = 2
    state = jax.random.normal(k_state, (batch, input_dims[0]), jnp.float32)
    action = jax.random.normal(k_action, (batch, no_actions), jnp.float32)

    q = critic_forward(state, action, prep_f32)
    jax.block_until_ready(q)
    ref = _reference(state, action, params)
    assert q.shape == (batch, 1)
    assert jnp.allclose(q, ref, atol=1e-5, rtol=1e-5), "f32 small-batch mismatch"

    # --- check 2: default bf16 MXU-operand path, loose tolerance ---------------
    q_bf16 = critic_forward(state, action, prep_bf16)
    jax.block_until_ready(q_bf16)
    assert q_bf16.shape == (batch, 1)
    assert jnp.allclose(q_bf16, ref, atol=1e-1, rtol=1e-1), "bf16 mismatch"

    # --- check 3: larger, non-tile-multiple batch: multi-step grid with a
    #     partial tail block (no jnp.pad anywhere) -------------------------------
    big_b = 1300
    ks, ka = jax.random.split(k_big)
    state_b = jax.random.normal(ks, (big_b, input_dims[0]), jnp.float32)
    action_b = jax.random.normal(ka, (big_b, no_actions), jnp.float32)
    q_big = critic_forward(state_b, action_b, prep_f32, tile_b=512)
    jax.block_until_ready(q_big)
    ref_big = _reference(state_b, action_b, params)
    assert q_big.shape == (big_b, 1)
    assert jnp.allclose(q_big, ref_big, atol=1e-5, rtol=1e-5), "gridded mismatch"

    # --- check 4: large batch with the default (big) tile ----------------------
    q_big2 = critic_forward(state_b, action_b, prep_bf16)
    jax.block_until_ready(q_big2)
    assert q_big2.shape == (big_b, 1)
    assert jnp.allclose(q_big2, ref_big, atol=1e-1, rtol=1e-1), "bf16 big-batch mismatch"

    print("KERNEL_OK")
</pallas_src>

<mosaic_0001>
module attributes {stable_mosaic.version = 11 : i64} {
  func.func @critic_kernel(%arg0: i32, %arg1: memref<2x16xf32, #tpu.memory_space<vmem>>, %arg2: memref<2x4xf32, #tpu.memory_space<vmem>>, %arg3: memref<16x32xf32, #tpu.memory_space<vmem>>, %arg4: memref<4x32xf32, #tpu.memory_space<vmem>>, %arg5: memref<1x32xf32, #tpu.memory_space<vmem>>, %arg6: memref<32x32xf32, #tpu.memory_space<vmem>>, %arg7: memref<1x32xf32, #tpu.memory_space<vmem>>, %arg8: memref<1x32xf32, #tpu.memory_space<vmem>>, %arg9: memref<1x1xf32, #tpu.memory_space<vmem>>, %arg10: memref<2x1xf32, #tpu.memory_space<vmem>>) attributes {dimension_semantics = [#tpu.dimension_semantics<parallel>], iteration_bounds = array<i64: 1>, scalar_prefetch = 0 : i64, scratch_operands = 0 : i64, tpu.core_type = #tpu.core_type<tc>, window_params = [{transform_indices = @transform_0, window_bounds = array<i64: 2, 16>}, {transform_indices = @transform_1, window_bounds = array<i64: 2, 4>}, {pipeline_mode = #tpu.pipeline_mode<synchronous>, transform_indices = @transform_2, window_bounds = array<i64: 16, 32>}, {pipeline_mode = #tpu.pipeline_mode<synchronous>, transform_indices = @transform_3, window_bounds = array<i64: 4, 32>}, {pipeline_mode = #tpu.pipeline_mode<synchronous>, transform_indices = @transform_4, window_bounds = array<i64: 1, 32>}, {pipeline_mode = #tpu.pipeline_mode<synchronous>, transform_indices = @transform_5, window_bounds = array<i64: 32, 32>}, {pipeline_mode = #tpu.pipeline_mode<synchronous>, transform_indices = @transform_6, window_bounds = array<i64: 1, 32>}, {pipeline_mode = #tpu.pipeline_mode<synchronous>, transform_indices = @transform_7, window_bounds = array<i64: 1, 32>}, {pipeline_mode = #tpu.pipeline_mode<synchronous>, transform_indices = @transform_8, window_bounds = array<i64: 1, 1>}, {transform_indices = @transform_9, window_bounds = array<i64: 2, 1>}]} {
    %c0 = arith.constant 0 : index
    %c0_0 = arith.constant 0 : index
    %0 = vector.load %arg1[%c0, %c0_0] : memref<2x16xf32, #tpu.memory_space<vmem>>, vector<2x16xf32>
    %c0_1 = arith.constant 0 : index
    %c0_2 = arith.constant 0 : index
    %1 = vector.load %arg2[%c0_1, %c0_2] : memref<2x4xf32, #tpu.memory_space<vmem>>, vector<2x4xf32>
    %c0_3 = arith.constant 0 : index
    %c0_4 = arith.constant 0 : index
    %2 = vector.load %arg3[%c0_3, %c0_4] : memref<16x32xf32, #tpu.memory_space<vmem>>, vector<16x32xf32>
    %cst = arith.constant dense<0.000000e+00> : vector<2x32xf32>
    %3 = tpu.matmul %0, %2, %cst {dimension_numbers = #tpu.dot_dimension_numbers<[1], [0], [0], [1], [0, 0, 1, 1], [], []>} : vector<2x16xf32>, vector<16x32xf32>, vector<2x32xf32> -> vector<2x32xf32>
    %c0_5 = arith.constant 0 : index
    %c0_6 = arith.constant 0 : index
    %4 = vector.load %arg4[%c0_5, %c0_6] : memref<4x32xf32, #tpu.memory_space<vmem>>, vector<4x32xf32>
    %cst_7 = arith.constant dense<0.000000e+00> : vector<2x32xf32>
    %5 = tpu.matmul %1, %4, %cst_7 {dimension_numbers = #tpu.dot_dimension_numbers<[1], [0], [0], [1], [0, 0, 1, 1], [], []>} : vector<2x4xf32>, vector<4x32xf32>, vector<2x32xf32> -> vector<2x32xf32>
    %6 = arith.addf %3, %5 : vector<2x32xf32>
    %c0_8 = arith.constant 0 : index
    %c0_9 = arith.constant 0 : index
    %7 = vector.load %arg5[%c0_8, %c0_9] : memref<1x32xf32, #tpu.memory_space<vmem>>, vector<1x32xf32>
    %8 = vector.broadcast %7 : vector<1x32xf32> to vector<2x32xf32>
    %9 = arith.addf %6, %8 : vector<2x32xf32>
    %cst_10 = arith.constant 0.000000e+00 : f32
    %10 = vector.broadcast %cst_10 : f32 to vector<2x32xf32>
    %11 = arith.maximumf %9, %10 : vector<2x32xf32>
    %c0_11 = arith.constant 0 : index
    %c0_12 = arith.constant 0 : index
    %12 = vector.load %arg6[%c0_11, %c0_12] : memref<32x32xf32, #tpu.memory_space<vmem>>, vector<32x32xf32>
    %cst_13 = arith.constant dense<0.000000e+00> : vector<2x32xf32>
    %13 = tpu.matmul %11, %12, %cst_13 {dimension_numbers = #tpu.dot_dimension_numbers<[1], [0], [0], [1], [0, 0, 1, 1], [], []>} : vector<2x32xf32>, vector<32x32xf32>, vector<2x32xf32> -> vector<2x32xf32>
    %c0_14 = arith.constant 0 : index
    %c0_15 = arith.constant 0 : index
    %14 = vector.load %arg7[%c0_14, %c0_15] : memref<1x32xf32, #tpu.memory_space<vmem>>, vector<1x32xf32>
    %15 = vector.broadcast %14 : vector<1x32xf32> to vector<2x32xf32>
    %16 = arith.addf %13, %15 : vector<2x32xf32>
    %cst_16 = arith.constant 0.000000e+00 : f32
    %17 = vector.broadcast %cst_16 : f32 to vector<2x32xf32>
    %18 = arith.maximumf %16, %17 : vector<2x32xf32>
    %c0_17 = arith.constant 0 : index
    %c0_18 = arith.constant 0 : index
    %19 = vector.load %arg8[%c0_17, %c0_18] : memref<1x32xf32, #tpu.memory_space<vmem>>, vector<1x32xf32>
    %20 = vector.broadcast %19 : vector<1x32xf32> to vector<2x32xf32>
    %21 = arith.mulf %18, %20 : vector<2x32xf32>
    %cst_19 = arith.constant dense<0.000000e+00> : vector<2xf32>
    %22 = vector.multi_reduction <add>, %21, %cst_19 [1] : vector<2x32xf32> to vector<2xf32>
    %23 = vector.shape_cast %22 : vector<2xf32> to vector<2x1xf32>
    %c0_20 = arith.constant 0 : index
    %c0_21 = arith.constant 0 : index
    %24 = vector.load %arg9[%c0_20, %c0_21] : memref<1x1xf32, #tpu.memory_space<vmem>>, vector<1x1xf32>
    %25 = vector.broadcast %24 : vector<1x1xf32> to vector<2x1xf32>
    %26 = arith.addf %23, %25 : vector<2x1xf32>
    %c0_22 = arith.constant 0 : index
    %c0_23 = arith.constant 0 : index
    %27 = vector.load %arg10[%c0_22, %c0_23] : memref<2x1xf32, #tpu.memory_space<vmem>>, vector<2x1xf32>
    tpu.vector_store %arg10[%c0_22, %c0_23], %26 {strides = array<i32>} : memref<2x1xf32, #tpu.memory_space<vmem>>, vector<2x1xf32>,
    return
  }
  func.func @transform_0(%arg0: i32) -> (i32, i32) {
    %c0_i32 = arith.constant 0 : i32
    %c0_i32_0 = arith.constant 0 : i32
    return %arg0, %c0_i32 : i32, i32
  }
  func.func @transform_1(%arg0: i32) -> (i32, i32) {
    %c0_i32 = arith.constant 0 : i32
    %c0_i32_0 = arith.constant 0 : i32
    return %arg0, %c0_i32 : i32, i32
  }
  func.func @transform_2(%arg0: i32) -> (i32, i32) {
    %c0_i32 = arith.constant 0 : i32
    %c0_i32_0 = arith.constant 0 : i32
    %c0_i32_1 = arith.constant 0 : i32
    return %c0_i32, %c0_i32_0 : i32, i32
  }
  func.func @transform_3(%arg0: i32) -> (i32, i32) {
    %c0_i32 = arith.constant 0 : i32
    %c0_i32_0 = arith.constant 0 : i32
    %c0_i32_1 = arith.constant 0 : i32
    return %c0_i32, %c0_i32_0 : i32, i32
  }
  func.func @transform_4(%arg0: i32) -> (i32, i32) {
    %c0_i32 = arith.constant 0 : i32
    %c0_i32_0 = arith.constant 0 : i32
    %c0_i32_1 = arith.constant 0 : i32
    return %c0_i32, %c0_i32_0 : i32, i32
  }
  func.func @transform_5(%arg0: i32) -> (i32, i32) {
    %c0_i32 = arith.constant 0 : i32
    %c0_i32_0 = arith.constant 0 : i32
    %c0_i32_1 = arith.constant 0 : i32
    return %c0_i32, %c0_i32_0 : i32, i32
  }
  func.func @transform_6(%arg0: i32) -> (i32, i32) {
    %c0_i32 = arith.constant 0 : i32
    %c0_i32_0 = arith.constant 0 : i32
    %c0_i32_1 = arith.constant 0 : i32
    return %c0_i32, %c0_i32_0 : i32, i32
  }
  func.func @transform_7(%arg0: i32) -> (i32, i32) {
    %c0_i32 = arith.constant 0 : i32
    %c0_i32_0 = arith.constant 0 : i32
    %c0_i32_1 = arith.constant 0 : i32
    return %c0_i32, %c0_i32_0 : i32, i32
  }
  func.func @transform_8(%arg0: i32) -> (i32, i32) {
    %c0_i32 = arith.constant 0 : i32
    %c0_i32_0 = arith.constant 0 : i32
    %c0_i32_1 = arith.constant 0 : i32
    return %c0_i32, %c0_i32_0 : i32, i32
  }
  func.func @transform_9(%arg0: i32) -> (i32, i32) {
    %c0_i32 = arith.constant 0 : i32
    %c0_i32_0 = arith.constant 0 : i32
    return %arg0, %c0_i32 : i32, i32
  }
}

</mosaic_0001>

<bundles_post_ra>
// kernel: tpu_custom_call.1
= control target key start
LH: loop header
LB: loop body
LE: loop exit
PB: predicated region body
PF: predicated region fallthrough
CT: control target
= control target key end

     0   :  { %s552_s0 = inlined_call_operand.vmem [shape: f32[2,16], index: 0, kind: input, shape index: {}]   ;;  %s553_s1 = inlined_call_operand.hbm [shape: f32[2,4], index: 1, kind: input, shape index: {}]   ;;  %s554_s2 = inlined_call_operand.hbm [shape: f32[16,32], index: 2, kind: input, shape index: {}]   ;;  %s555_s3 = inlined_call_operand.vmem [shape: f32[4,32], index: 3, kind: input, shape index: {}]   ;;  %s556_s4 = inlined_call_operand.vmem [shape: f32[1,32], index: 4, kind: input, shape index: {}]   ;;  %s557_s5 = inlined_call_operand.hbm [shape: f32[32,32], index: 5, kind: input, shape index: {}]   ;;  %s558_s6 = inlined_call_operand.vmem [shape: f32[1,32], index: 6, kind: input, shape index: {}]   ;;  %s559_s7 = inlined_call_operand.vmem [shape: f32[1,32], index: 7, kind: input, shape index: {}]   ;;  %s560_s8 = inlined_call_operand.<no memory space> [shape: f32[1,1], index: 8, kind: input, shape index: {}]   ;;  %s561_s9 = inlined_call_operand.vmem [shape: f32[2,1], index: 9, kind: output, shape index: {}]  }
   0x1   :  { %v14_v0 = vstv %s560_s8 }
   0x2   :  { %15 = vst [vmem:[#allocation2] sm:$0x1] %v14_v0 }
   0x3   :  { %16 = vsyncpa [#allocation4], 0 }
   0x4   :  { %17 = vsyncpa [#allocation6], 0  ;;  %s465_s11 = smov [#allocation5]  }
   0x5   :  { %s35_s12 = sshll.u32 %s465_s11, 4  ;;  %s36_s12 = int_to_ptr.vmem [resolvable:$true] %s35_s12 }
   0x6   :  { %s409_s13 = scalar_lea.vmem %s36_s12, 256  ;;  %p414_p1 = scmp.lt.s32.totalorder %s36_s12, %s36_s12 }
   0x7   :  { %p410_p0 = scmp.ne.s32.totalorder %s36_s12, %s409_s13  ;;  %p415_p2 = scmp.lt.s32.totalorder %s409_s13, %s409_s13 }
   0x9   :  { %p416_p3 = por %p415_p2, %p414_p1 }
   0xb   :  { %p417_p4 = pnand %p416_p3, %p410_p0 }
   0xd   :  { %420 = shalt.err (!%p417_p4)
}
   0xe   :  { %s466_s14 = smov 128   ;;  %s467_s15 = smov 8  }
   0xf   :  { %41 = dma.hbm_to_vmem [thread:$0]  %s554_s2, 256, %s36_s12, [#allocation6], %s466_s14, %s466_s14, %s467_s15  }
  0x10   :  { %s468_s8 = smov [#allocation3]   ;;  %s469_s19 = smov [#allocation7]  }
  0x11   :  { %s26_s18 = sshll.u32 %s468_s8, 4  ;;  %s51_s20 = sshll.u32 %s469_s19, 4  ;;  %s27_s18 = int_to_ptr.vmem [resolvable:$true] %s26_s18  ;;  %s52_s20 = int_to_ptr.vmem [resolvable:$true] %s51_s20 }
  0x12   :  { %s429_s21 = scalar_lea.vmem %s27_s18, 32  ;;  %p434_p6 = scmp.lt.s32.totalorder %s27_s18, %s27_s18 }
  0x13   :  { %p430_p5 = scmp.ne.s32.totalorder %s27_s18, %s429_s21  ;;  %p435_p7 = scmp.lt.s32.totalorder %s429_s21, %s429_s21 }
  0x15   :  { %p436_p8 = por %p435_p7, %p434_p6 }
  0x17   :  { %p437_p9 = pnand %p436_p8, %p430_p5 }
  0x19   :  { %440 = shalt.err (!%p437_p9)
}
  0x1a   :  { %29 = dma.hbm_to_vmem [thread:$0]  %s553_s1, 32, %s27_s18, [#allocation4]  }
  0x1b   :  { %s449_s24 = scalar_lea.vmem %s52_s20, 512  ;;  %p454_p11 = scmp.lt.s32.totalorder %s52_s20, %s52_s20 }
  0x1c   :  { %p450_p10 = scmp.ne.s32.totalorder %s52_s20, %s449_s24  ;;  %p455_p12 = scmp.lt.s32.totalorder %s449_s24, %s449_s24 }
  0x1e   :  { %p456_p13 = por %p455_p12, %p454_p11 }
  0x20   :  { %p457_p0 = pnand %p456_p13, %p450_p10 }
  0x22   :  { %460 = shalt.err (!%p457_p0)
}
  0x23   :  { %57 = dma.hbm_to_vmem [thread:$0]  %s557_s5, 512, %s52_s20, [#allocation6], %s466_s14, %s466_s14, %s467_s15  }
  0x24   :  { %461 = dma.done.wait [#allocation4], 32  }
  0x25   :  { %462 = vsyncadd [#allocation4], 4294967264 }
  0x26   :  { %463 = dma.done.wait [#allocation6], 768  }
  0x27   :  { %464 = vsyncadd [#allocation6], 4294966528  ;;  %v470_v1 = vmov 0.0   ;;  %vm471_vm0 = vmmov 0   ;;  %vm82_vm1 = vcmask 1043456   ;;  %vm78_vm2 = vcmask 31744  }
  0x28   :  { %371 = vmatprep.subr.mxu1 %v470_v1  ;;  %373 = vmatprep.mubr.msk.f32.mxu1 %vm471_vm0, %v470_v1  ;;  %v77_v2 = vld [vmem:[%s555_s3] sm:$0xf]  ;;  %v76_v4 = vld [vmem:[#allocation5 + $0x8] sm:$0xff]  ;;  %vm156_vm3 = vcmask 130048   ;;  %v239_v10 = vld [vmem:[#allocation7] sm:$0xff]  ;;  %vm250_vm4 = vcmask 261120  }
  0x29   :  { %383 = vmatprep.subr.mxu0 %v470_v1  ;;  %391 = vmatprep.mubr.msk.f32.mxu0 %vm471_vm0, %v470_v1  ;;  %v74_v3 = vld [vmem:[#allocation3] sm:$0x3]  ;;  %v75_v5 = vld [vmem:[#allocation5] sm:$0xff]  ;;  %v242_v7 = vld [vmem:[#allocation7 + $0x18] sm:$0xff]  ;;  %vm333_vm5 = vcmask 254976   ;;  %vm345_vm6 = vcmask 1024  }
  0x2a   :  { %372 = vmatpush3.msk.msra.mxu1 %vm82_vm1, %v77_v2  ;;  %v73_v6 = vld [vmem:[%s552_s0] sm:$0x3]  ;;  %384 = vmatpush3.msra.mxu0 %v242_v7  ;;  %v241_v8 = vld [vmem:[#allocation7 + $0x10] sm:$0xff] }
  0x2b   :  { %374 = vmatmul.mubr.msk.f32.vlgmr.msra.gmra.mxu1 %vm78_vm2, %v74_v3  ;;  %376 = vmatprep.subr.mxu1 %v470_v1  ;;  %v240_v9 = vld [vmem:[#allocation7 + $0x8] sm:$0xff] }
  0x2c   :  { %377 = vmatpush3.msra.mxu1 %v76_v4  ;;  %380 = vmatprep.mubr.msk.f32.mxu1 %vm471_vm0, %v470_v1  ;;  %v356_v14 = vld [vmem:[%s556_s4] ss:$0 sm:$0xff] }
  0x2d   :  { %378 = vmatprep.subr.mxu1 %v470_v1  ;;  %385 = vmatprep.subr.mxu0 %v470_v1  ;;  %v357_v19 = vld [vmem:[%s558_s6] ss:$0 sm:$0xff] }
  0x2e   :  { %379 = vmatpush3.msra.mxu1 %v75_v5  ;;  %386 = vmatpush3.msra.mxu0 %v241_v8  ;;  %v359_v23 = vld [vmem:[%s559_s7] ss:$0 sm:$0xff] }
  0x2f   :  { %381 = vmatmul.mubr.msk.f32.vlgmr.msra.gmra.mxu1 %vm156_vm3, %v73_v6  ;;  %387 = vmatprep.subr.mxu0 %v470_v1  ;;  %v360_v27 = vld [vmem:[#allocation2] ss:$0 sm:$0xff] }
  0x30   :  { %388 = vmatpush3.msra.mxu0 %v240_v9 }
  0x31   :  { %389 = vmatprep.subr.mxu0 %v470_v1 }
  0x32   :  { %390 = vmatpush3.msra.mxu0 %v239_v10 }
  0xeb   :  { %v152_v11 = vpop.f32.mrf.mxu1 }
  0xed   :  { %v375_v12 = vpop.f32.mrf.mxu1 }
  0xef   :  { %v226_v13 = vpop.f32.mrf.mxu1 }
  0xf0   :  { %v227_v15 = vadd.f32 %v226_v13, %v152_v11 }
  0xf1   :  { %v382_v16 = vpop.f32.mrf.mxu1 }
  0xf2   :  { %v237_v17 = vadd.f32 %v356_v14, %v227_v15 }
  0xf4   :  { %v238_v18 = vmax.f32 %v237_v17, 0.0 }
  0xf6   :  { %392 = vmatmul.mubr.msk.f32.vlgmr.msra.gmra.mxu0 %vm250_vm4, %v238_v18 }
 0x1b6   :  { %v320_v20 = vpop.f32.mrf.mxu0 }
 0x1b7   :  { %v321_v21 = vadd.f32 %v357_v19, %v320_v20 }
 0x1b8   :  { %v393_v22 = vpop.f32.mrf.mxu0 }
 0x1b9   :  { %v324_v24 = vmax.f32 %v321_v21, 0.0 }
 0x1bb   :  { %v332_v25 = vmul.f32 %v359_v23, %v324_v24 }
 0x1bd   :  { %v334_v26 = vsel %vm333_vm5, %v332_v25, 0.0 }
 0x1be   :  { %335 = vadd.xlane.f32.xlu0 %v334_v26 }
 0x247   :  { %v336_v28 = vpop.xlane.xlu0 %335 }
 0x248   :  { %v344_v29 = vadd.f32 %v360_v27, %v336_v28 }
 0x24a   :  { %346 = vst.msk [vmem:[%s561_s9] sm:$0x3] %vm345_vm6, %v344_v29 }
 0x24b   :  { %351 = vsyncpa [#allocation4], 1 }
 0x24c   :  { %352 = vsyncpa [#allocation6], 1 }

</bundles_post_ra>
